<compile_context>
chip_gen: v7x
topology: tpu7x:2x2x1
jax: 0.10.0
libtpu: 0.0.40
codegen_flags: <defaults>
</compile_context>

<pallas_src>
import functools

import jax
import jax.numpy as jnp
from jax import lax
from jax.experimental import pallas as pl
from jax.experimental.pallas import tpu as pltpu


# ---------------------------------------------------------------------------
# Fast path: table resident in VMEM, gather via one-hot matmul on the MXU.
# ---------------------------------------------------------------------------
def _onehot_gather_kernel(ids_ref, emb_ref, out_ref):
    # ids_ref: (CHUNK, 1) int32 VMEM block of token ids for this chunk.
    # emb_ref: (V_pad, D_pad) VMEM -- the full (padded) embedding table, resident.
    # out_ref: (CHUNK, D_pad) VMEM output block.
    chunk = out_ref.shape[0]
    v_pad = emb_ref.shape[0]

    ids = ids_ref[...]                                            # (CHUNK, 1)
    cols = lax.broadcasted_iota(jnp.int32, (chunk, v_pad), 1)     # (CHUNK, V_pad)
    onehot = (cols == ids).astype(emb_ref.dtype)                  # (CHUNK, V_pad)
    out_ref[...] = jnp.dot(
        onehot, emb_ref[...], preferred_element_type=jnp.float32
    ).astype(out_ref.dtype)


# ---------------------------------------------------------------------------
# Fallback: table in HBM, manual per-row DMA gather driven by SMEM token ids.
# ---------------------------------------------------------------------------
def _dma_gather_kernel(ids_ref, emb_hbm, out_ref, scratch, sem):
    # ids_ref: (N_pad,) int32 scalar-prefetched token ids in SMEM.
    # emb_hbm: (V, D_pad) embedding table ref left in HBM (memory_space=pl.ANY).
    # out_ref: (CHUNK, D_pad) VMEM output block.
    # scratch: (CHUNK, D_pad) VMEM gather buffer.
    # sem    : single DMA semaphore shared by all row copies of this chunk.
    chunk = out_ref.shape[0]
    base = pl.program_id(0) * chunk

    # Issue all CHUNK row gathers back-to-back so they are in flight concurrently.
    def issue(r, carry):
        tok = ids_ref[base + r]
        pltpu.make_async_copy(
            emb_hbm.at[pl.ds(tok, 1), :],
            scratch.at[pl.ds(r, 1), :],
            sem,
        ).start()
        return carry

    lax.fori_loop(0, chunk, issue, 0)

    # Batched wait: each wait accounts for one row's bytes on the shared semaphore.
    def wait(r, carry):
        pltpu.make_async_copy(
            emb_hbm.at[pl.ds(0, 1), :],        # dummy src slice; only dst bytes matter
            scratch.at[pl.ds(r, 1), :],
            sem,
        ).wait()
        return carry

    lax.fori_loop(0, chunk, wait, 0)

    # TODO(synk): double-buffer the scratch at chunk granularity ((2, CHUNK, D))
    # to overlap next-chunk DMA issue with this chunk's dense writeback.
    out_ref[...] = scratch[...]


# ---------------------------------------------------------------------------
# Wrapper
# ---------------------------------------------------------------------------
def embedding_lookup(ids_flat, emb_table, *, chunk=128, force_dma=False):
    """Gather rows of `emb_table` (V, D) at `ids_flat` (N,) -> (N, D)."""
    V, D = emb_table.shape
    N = ids_flat.shape[0]
    dtype = emb_table.dtype
    itemsize = jnp.dtype(dtype).itemsize

    # Clamp ids so a bad token id can never drive an out-of-bounds DMA.
    # (PyTorch would raise here instead; clamping keeps the kernel safe.)
    ids = jnp.clip(ids_flat.astype(jnp.int32), 0, V - 1)

    # Pad the token count to a multiple of `chunk` and the embedding dim to a
    # multiple of 128 so output blocks are fully (8, 128)-tiled (unmasked stores).
    n_pad = pl.cdiv(N, chunk) * chunk
    d_pad = pl.cdiv(D, 128) * 128
    ids_p = jnp.pad(ids, (0, n_pad - N))
    emb_p = emb_table if d_pad == D else jnp.pad(emb_table, ((0, 0), (0, d_pad - D)))

    n_chunks = n_pad // chunk
    table_bytes = V * d_pad * itemsize
    # Resident fast path only when the table comfortably fits VMEM on every TPU
    # generation (v7x has 64 MiB physical / 32 MiB default scoped).
    use_resident = (not force_dma) and table_bytes <= (16 << 20)

    if use_resident:
        v_pad = pl.cdiv(V, 128) * 128          # dense contraction dim for the MXU
        if v_pad != V:
            emb_p = jnp.pad(emb_p, ((0, v_pad - V), (0, 0)))
        ids_col = ids_p.reshape(n_pad, 1)

        vmem_needed = (v_pad * d_pad * itemsize            # resident table
                       + 2 * chunk * d_pad * itemsize      # double-buffered output
                       + 2 * chunk * 4                     # ids blocks
                       + (1 << 20))                        # headroom
        vmem_limit = int(min(56 << 20, max(32 << 20, vmem_needed)))

        out = pl.pallas_call(
            _onehot_gather_kernel,
            out_shape=jax.ShapeDtypeStruct((n_pad, d_pad), dtype),
            grid=(n_chunks,),
            in_specs=[
                pl.BlockSpec((chunk, 1), lambda i: (i, 0)),
                pl.BlockSpec((v_pad, d_pad), lambda i: (0, 0)),   # resident table
            ],
            out_specs=pl.BlockSpec((chunk, d_pad), lambda i: (i, 0)),
            compiler_params=pltpu.CompilerParams(
                dimension_semantics=("parallel",),
                vmem_limit_bytes=vmem_limit,
            ),
        )(ids_col, emb_p)
    else:
        out = pl.pallas_call(
            _dma_gather_kernel,
            out_shape=jax.ShapeDtypeStruct((n_pad, d_pad), dtype),
            grid_spec=pltpu.PrefetchScalarGridSpec(
                num_scalar_prefetch=1,                      # ids -> SMEM
                grid=(n_chunks,),
                in_specs=[pl.BlockSpec(memory_space=pl.ANY)],   # table stays in HBM
                out_specs=pl.BlockSpec((chunk, d_pad), lambda i, ids: (i, 0)),
                scratch_shapes=[
                    pltpu.VMEM((chunk, d_pad), dtype),
                    pltpu.SemaphoreType.DMA(()),
                ],
            ),
            compiler_params=pltpu.CompilerParams(
                dimension_semantics=("arbitrary",)),
        )(ids_p, emb_p)

    return out[:N, :D]


class CNNTruncateHead:
    """JAX/Pallas port of CNN_truncate_head (forward only)."""

    def __init__(self, vocab_size, embedding_dim, n_filters, filter_sizes,
                 output_dim, dropout, pad_idx, trucate_size, key):
        assert trucate_size != 0
        self.pad_idx = pad_idx
        self.trucate_size = trucate_size
        # nn.Embedding default init: N(0, 1); the padding_idx row is zeroed.
        w = jax.random.normal(key, (vocab_size, embedding_dim), dtype=jnp.float32)
        w = w.at[pad_idx].set(0.0)
        self.embedding_weight = w
        # n_filters / filter_sizes / output_dim / dropout are unused by this
        # module's __init__/forward (only the embedding exists) -> nothing to build.

    def __call__(self, text, *, force_dma=False):
        B, S = text.shape
        D = self.embedding_weight.shape[1]
        flat = text.reshape(B * S).astype(jnp.int32)
        emb = embedding_lookup(flat, self.embedding_weight,
                               force_dma=force_dma)            # (B*S, D)
        embedded = emb.reshape(B, S, D)                        # (B, S, D)
        return embedded[:, None, :, :]                         # unsqueeze(1) -> (B,1,S,D)


if __name__ == "__main__":
    key = jax.random.PRNGKey(0)
    k_emb, k_ids = jax.random.split(key)

    # Small shapes consistent with the module's forward.
    vocab_size = 32
    embedding_dim = 128
    batch, seq = 2, 8
    pad_idx = 1

    model = CNNTruncateHead(
        vocab_size=vocab_size, embedding_dim=embedding_dim,
        n_filters=4, filter_sizes=[3, 4, 5], output_dim=2,
        dropout=0.5, pad_idx=pad_idx, trucate_size=4, key=k_emb)

    text = jax.random.randint(k_ids, (batch, seq), 0, vocab_size, dtype=jnp.int32)
    # Inject a couple of pad tokens to exercise the zeroed padding row.
    text = text.at[0, -1].set(pad_idx).at[1, -2].set(pad_idx)

    # Pure-JAX reference (take + unsqueeze).
    ref = jnp.take(model.embedding_weight, text, axis=0)[:, None, :, :]

    # Auto-dispatched path (table is tiny -> VMEM-resident one-hot matmul gather).
    out = model(text)
    out = jax.block_until_ready(out)
    assert out.shape == (batch, 1, seq, embedding_dim)
    assert out.dtype == jnp.float32
    assert jnp.allclose(out, ref), "mismatch vs reference (resident path)"

    # Also exercise the large-table manual DMA-gather path on the same data.
    out_dma = model(text, force_dma=True)
    out_dma = jax.block_until_ready(out_dma)
    assert jnp.allclose(out_dma, ref), "mismatch vs reference (DMA gather path)"

    print("KERNEL_OK")
</pallas_src>

<mosaic_0001>
module attributes {stable_mosaic.version = 11 : i64} {
  func.func @_onehot_gather_kernel(%arg0: i32, %arg1: memref<128x1xi32, #tpu.memory_space<vmem>>, %arg2: memref<128x128xf32, #tpu.memory_space<vmem>>, %arg3: memref<128x128xf32, #tpu.memory_space<vmem>>) attributes {dimension_semantics = [#tpu.dimension_semantics<parallel>], iteration_bounds = array<i64: 1>, scalar_prefetch = 0 : i64, scratch_operands = 0 : i64, tpu.core_type = #tpu.core_type<tc>, window_params = [{transform_indices = @transform_0, window_bounds = array<i64: 128, 1>}, {pipeline_mode = #tpu.pipeline_mode<synchronous>, transform_indices = @transform_1, window_bounds = array<i64: 128, 128>}, {transform_indices = @transform_2, window_bounds = array<i64: 128, 128>}]} {
    %c0 = arith.constant 0 : index
    %c0_0 = arith.constant 0 : index
    %0 = vector.load %arg1[%c0, %c0_0] : memref<128x1xi32, #tpu.memory_space<vmem>>, vector<128x1xi32>
    %1 = tpu.iota {dimensions = array<i32: 1>} : vector<128x128xi32>
    %2 = vector.broadcast %0 : vector<128x1xi32> to vector<128x128xi32>
    %3 = arith.cmpi eq, %1, %2 : vector<128x128xi32>
    %4 = arith.extui %3 : vector<128x128xi1> to vector<128x128xi32>
    %5 = arith.sitofp %4 : vector<128x128xi32> to vector<128x128xf32>
    %c0_1 = arith.constant 0 : index
    %c0_2 = arith.constant 0 : index
    %6 = vector.load %arg2[%c0_1, %c0_2] : memref<128x128xf32, #tpu.memory_space<vmem>>, vector<128x128xf32>
    %cst = arith.constant dense<0.000000e+00> : vector<128x128xf32>
    %7 = tpu.matmul %5, %6, %cst {dimension_numbers = #tpu.dot_dimension_numbers<[1], [0], [0], [1], [0, 0, 1, 1], [], []>} : vector<128x128xf32>, vector<128x128xf32>, vector<128x128xf32> -> vector<128x128xf32>
    %c0_3 = arith.constant 0 : index
    %c0_4 = arith.constant 0 : index
    %8 = vector.load %arg3[%c0_3, %c0_4] : memref<128x128xf32, #tpu.memory_space<vmem>>, vector<128x128xf32>
    tpu.vector_store %arg3[%c0_3, %c0_4], %7 {strides = array<i32>} : memref<128x128xf32, #tpu.memory_space<vmem>>, vector<128x128xf32>,
    return
  }
  func.func @transform_0(%arg0: i32) -> (i32, i32) {
    %c0_i32 = arith.constant 0 : i32
    %c0_i32_0 = arith.constant 0 : i32
    return %arg0, %c0_i32 : i32, i32
  }
  func.func @transform_1(%arg0: i32) -> (i32, i32) {
    %c0_i32 = arith.constant 0 : i32
    %c0_i32_0 = arith.constant 0 : i32
    %c0_i32_1 = arith.constant 0 : i32
    return %c0_i32, %c0_i32_0 : i32, i32
  }
  func.func @transform_2(%arg0: i32) -> (i32, i32) {
    %c0_i32 = arith.constant 0 : i32
    %c0_i32_0 = arith.constant 0 : i32
    return %arg0, %c0_i32 : i32, i32
  }
}

</mosaic_0001>

<bundles_post_ra>
// kernel: tpu_custom_call.1
= control target key start
LH: loop header
LB: loop body
LE: loop exit
PB: predicated region body
PF: predicated region fallthrough
CT: control target
= control target key end

     0   :  { %v518_v2 = vmov 0   ;;  %s646_s0 = inlined_call_operand.vmem [shape: s32[128,1], index: 0, kind: input, shape index: {}]   ;;  %s647_s1 = inlined_call_operand.vmem [shape: f32[128,128], index: 1, kind: input, shape index: {}]   ;;  %s648_s2 = inlined_call_operand.hbm [shape: f32[128,128], index: 2, kind: output, shape index: {}]  }
   0x1   :  { %v13_v0 = vld [vmem:[%s646_s0 + $0x8] sm:$0xff]  ;;  %v12_v1 = vld [vmem:[%s646_s0] sm:$0xff]  ;;  %493 = vset.pattern.permute.xlu1 %v518_v2  ;;  %492 = vset.pattern.permute.xlu0 %v518_v2  ;;  %v128_v8 = vld [vmem:[%s647_s1 + $0x10] sm:$0xff] }
   0x2   :  { %34 = vperm.xlu1 %493, %v13_v0   ;;  %31 = vperm.xlu0 %492, %v12_v1   ;;  %v21_v3 = vld [vmem:[%s646_s0 + $0x48] sm:$0xff]  ;;  %v20_v4 = vld [vmem:[%s646_s0 + $0x40] sm:$0xff]  ;;  %v129_v9 = vld [vmem:[%s647_s1 + $0x18] sm:$0xff] }
   0x3   :  { %v126_v5 = vld [vmem:[%s647_s1] sm:$0xff]  ;;  %v127_v6 = vld [vmem:[%s647_s1 + $0x8] sm:$0xff]  ;;  %v22_v10 = vld [vmem:[%s646_s0 + $0x50] sm:$0xff]  ;;  %v443_v12 = vpack.c.bf16 %v129_v9, %v128_v8 }
   0x4   :  { %v439_v7 = vpack.c.bf16 %v127_v6, %v126_v5  ;;  %v14_v11 = vld [vmem:[%s646_s0 + $0x10] sm:$0xff]  ;;  %v130_v13 = vld [vmem:[%s647_s1 + $0x20] sm:$0xff]  ;;  %v131_v14 = vld [vmem:[%s647_s1 + $0x28] sm:$0xff] }
   0x6   :  { %58 = vperm.xlu1 %493, %v21_v3   ;;  %55 = vperm.xlu0 %492, %v20_v4  }
   0x7   :  { %440 = vmatprep.subr.bf16.mxu0 %v439_v7  ;;  %471 = vmatprep.subr.bf16.mxu1 %v439_v7 }
   0x8   :  { %442 = vmatpush3.bf16.msra.mxu0 %v439_v7  ;;  %479 = vmatpush3.bf16.msra.mxu1 %v439_v7 }
   0xa   :  { %61 = vperm.xlu1 %493, %v22_v10   ;;  %37 = vperm.xlu0 %492, %v14_v11  }
   0xb   :  { %7 = vsyncpa [#allocation3], 0  ;;  %v23_v15 = vld [vmem:[%s646_s0 + $0x58] sm:$0xff]  ;;  %444 = vmatprep.subr.bf16.mxu0 %v443_v12  ;;  %472 = vmatprep.subr.bf16.mxu1 %v443_v12  ;;  %v447_v17 = vpack.c.bf16 %v131_v14, %v130_v13  ;;  %v132_v18 = vld [vmem:[%s647_s1 + $0x30] sm:$0xff]  ;;  %v28_v41 = vlaneseq  ;;  %v519_v45 = vmov 1.0  }
   0xc   :  { %v15_v16 = vld [vmem:[%s646_s0 + $0x18] sm:$0xff]  ;;  %446 = vmatpush3.bf16.msra.mxu0 %v443_v12  ;;  %480 = vmatpush3.bf16.msra.mxu1 %v443_v12  ;;  %v24_v20 = vld [vmem:[%s646_s0 + $0x60] sm:$0xff]  ;;  %v135_v24 = vld [vmem:[%s647_s1 + $0x48] sm:$0xff] }
   0xd   :  { %v133_v19 = vld [vmem:[%s647_s1 + $0x38] sm:$0xff]  ;;  %v16_v21 = vld [vmem:[%s646_s0 + $0x20] sm:$0xff]  ;;  %448 = vmatprep.subr.bf16.mxu0 %v447_v17  ;;  %473 = vmatprep.subr.bf16.mxu1 %v447_v17  ;;  %v25_v25 = vld [vmem:[%s646_s0 + $0x68] sm:$0xff]  ;;  %v29_v42 = vand.u32 127, %v28_v41 }
   0xe   :  { %64 = vperm.xlu1 %493, %v23_v15   ;;  %40 = vperm.xlu0 %492, %v15_v16   ;;  %v451_v22 = vpack.c.bf16 %v133_v19, %v132_v18  ;;  %v134_v23 = vld [vmem:[%s647_s1 + $0x40] sm:$0xff]  ;;  %v17_v26 = vld [vmem:[%s646_s0 + $0x28] sm:$0xff]  ;;  %v136_v28 = vld [vmem:[%s647_s1 + $0x50] sm:$0xff] }
   0xf   :  { %v455_v27 = vpack.c.bf16 %v135_v24, %v134_v23  ;;  %v137_v29 = vld [vmem:[%s647_s1 + $0x58] sm:$0xff]  ;;  %v26_v30 = vld [vmem:[%s646_s0 + $0x70] sm:$0xff]  ;;  %v138_v33 = vld [vmem:[%s647_s1 + $0x60] sm:$0xff] }
  0x10   :  { %450 = vmatpush3.bf16.msra.mxu0 %v447_v17  ;;  %481 = vmatpush3.bf16.msra.mxu1 %v447_v17  ;;  %v18_v31 = vld [vmem:[%s646_s0 + $0x30] sm:$0xff]  ;;  %v459_v32 = vpack.c.bf16 %v137_v29, %v136_v28  ;;  %v139_v34 = vld [vmem:[%s647_s1 + $0x68] sm:$0xff]  ;;  %v27_v35 = vld [vmem:[%s646_s0 + $0x78] sm:$0xff] }
  0x11   :  { %452 = vmatprep.subr.bf16.mxu0 %v451_v22  ;;  %474 = vmatprep.subr.bf16.mxu1 %v451_v22  ;;  %v19_v36 = vld [vmem:[%s646_s0 + $0x38] sm:$0xff]  ;;  %v463_v37 = vpack.c.bf16 %v139_v34, %v138_v33  ;;  %v140_v38 = vld [vmem:[%s647_s1 + $0x70] sm:$0xff]  ;;  %s520_s0 = smov [#allocation2]  }
  0x12   :  { %67 = vperm.xlu1 %493, %v24_v20   ;;  %43 = vperm.xlu0 %492, %v16_v21   ;;  %v141_v39 = vld [vmem:[%s647_s1 + $0x78] sm:$0xff]  ;;  %s308_s1 = sshll.u32 %s520_s0, 4  ;;  %s309_s1 = int_to_ptr.vmem [resolvable:$true] %s308_s1 }
  0x13   :  { %v467_v40 = vpack.c.bf16 %v141_v39, %v140_v38  ;;  %s494_s17 = scalar_lea.vmem %s309_s1, 2048  ;;  %p499_p1 = scmp.lt.s32.totalorder %s309_s1, %s309_s1 }
  0x14   :  { %454 = vmatpush3.bf16.msra.mxu0 %v451_v22  ;;  %482 = vmatpush3.bf16.msra.mxu1 %v451_v22  ;;  %p495_p0 = scmp.ne.s32.totalorder %s309_s1, %s494_s17  ;;  %p500_p2 = scmp.lt.s32.totalorder %s494_s17, %s494_s17 }
  0x15   :  { %456 = vmatprep.subr.bf16.mxu0 %v455_v27  ;;  %475 = vmatprep.subr.bf16.mxu1 %v455_v27 }
  0x16   :  { %70 = vperm.xlu1 %493, %v25_v25   ;;  %46 = vperm.xlu0 %492, %v17_v26   ;;  %p501_p3 = por %p500_p2, %p499_p1 }
  0x18   :  { %458 = vmatpush3.bf16.msra.mxu0 %v455_v27  ;;  %483 = vmatpush3.bf16.msra.mxu1 %v455_v27  ;;  %p502_p4 = pnand %p501_p3, %p495_p0 }
  0x19   :  { %460 = vmatprep.subr.bf16.mxu0 %v459_v32  ;;  %476 = vmatprep.subr.bf16.mxu1 %v459_v32 }
  0x1a   :  { %73 = vperm.xlu1 %493, %v26_v30   ;;  %49 = vperm.xlu0 %492, %v18_v31  }
  0x1c   :  { %462 = vmatpush3.bf16.msra.mxu0 %v459_v32  ;;  %484 = vmatpush3.bf16.msra.mxu1 %v459_v32 }
  0x1d   :  { %464 = vmatprep.subr.bf16.mxu0 %v463_v37  ;;  %477 = vmatprep.subr.bf16.mxu1 %v463_v37 }
  0x1e   :  { %76 = vperm.xlu1 %493, %v27_v35   ;;  %52 = vperm.xlu0 %492, %v19_v36  }
  0x20   :  { %466 = vmatpush3.bf16.msra.mxu0 %v463_v37  ;;  %485 = vmatpush3.bf16.msra.mxu1 %v463_v37 }
  0x21   :  { %468 = vmatprep.subr.bf16.mxu0 %v467_v40  ;;  %478 = vmatprep.subr.bf16.mxu1 %v467_v40 }
  0x24   :  { %470 = vmatpush3.bf16.msra.mxu0 %v467_v40  ;;  %486 = vmatpush3.bf16.msra.mxu1 %v467_v40 }
  0x81   :  { %v35_v43 = vpop.permute.xlu1 %34  ;;  %v32_v44 = vpop.permute.xlu0 %31 }
  0x82   :  { %vm79_vm0 = vcmp.eq.s32.totalorder %v29_v42, %v35_v43  ;;  %vm78_vm1 = vcmp.eq.s32.totalorder %v29_v42, %v32_v44 }
  0x83   :  { %415 = vmatprep.mubr.msk.f32.mxu0 %vm78_vm1, %v519_v45 }
  0x84   :  { %416 = vmatmul.mubr.msk.f32.vlgmr.msra.gmra.mrb[0].mxu0 %vm79_vm0, %v519_v45 }
  0x85   :  { %v59_v46 = vpop.permute.xlu1 %58  ;;  %v56_v47 = vpop.permute.xlu0 %55 }
  0x86   :  { %vm87_vm2 = vcmp.eq.s32.totalorder %v29_v42, %v59_v46  ;;  %vm86_vm3 = vcmp.eq.s32.totalorder %v29_v42, %v56_v47 }
  0x87   :  { %427 = vmatprep.mubr.msk.f32.mxu1 %vm86_vm3, %v519_v45 }
  0x88   :  { %428 = vmatmul.mubr.msk.f32.vlgmr.msra.gmra.mrb[0].mxu1 %vm87_vm2, %v519_v45 }
  0x89   :  { %v62_v48 = vpop.permute.xlu1 %61  ;;  %v38_v49 = vpop.permute.xlu0 %37 }
  0x8a   :  { %vm88_vm4 = vcmp.eq.s32.totalorder %v29_v42, %v62_v48  ;;  %vm80_vm5 = vcmp.eq.s32.totalorder %v29_v42, %v38_v49 }
  0x8b   :  { %418 = vmatprep.mubr.msk.f32.mxu0 %vm80_vm5, %v519_v45  ;;  %430 = vmatprep.mubr.msk.f32.mxu1 %vm88_vm4, %v519_v45 }
  0x8d   :  { %v65_v50 = vpop.permute.xlu1 %64  ;;  %v41_v51 = vpop.permute.xlu0 %40 }
  0x8e   :  { %vm89_vm6 = vcmp.eq.s32.totalorder %v29_v42, %v65_v50  ;;  %vm81_vm7 = vcmp.eq.s32.totalorder %v29_v42, %v41_v51 }
  0x8f   :  { %419 = vmatmul.mubr.msk.f32.gmra.mrb[2].mxu0 %vm81_vm7, %v519_v45  ;;  %431 = vmatmul.mubr.msk.f32.gmra.mrb[2].mxu1 %vm89_vm6, %v519_v45 }
  0x91   :  { %v68_v52 = vpop.permute.xlu1 %67  ;;  %v44_v53 = vpop.permute.xlu0 %43 }
  0x92   :  { %vm90_vm8 = vcmp.eq.s32.totalorder %v29_v42, %v68_v52  ;;  %vm82_vm9 = vcmp.eq.s32.totalorder %v29_v42, %v44_v53 }
  0x93   :  { %421 = vmatprep.mubr.msk.f32.mxu0 %vm82_vm9, %v519_v45  ;;  %433 = vmatprep.mubr.msk.f32.mxu1 %vm90_vm8, %v519_v45 }
  0x95   :  { %v71_v54 = vpop.permute.xlu1 %70  ;;  %v47_v55 = vpop.permute.xlu0 %46 }
  0x96   :  { %vm91_vm10 = vcmp.eq.s32.totalorder %v29_v42, %v71_v54  ;;  %vm83_vm11 = vcmp.eq.s32.totalorder %v29_v42, %v47_v55 }
  0x97   :  { %422 = vmatmul.mubr.msk.f32.gmra.mrb[4].mxu0 %vm83_vm11, %v519_v45  ;;  %434 = vmatmul.mubr.msk.f32.gmra.mrb[4].mxu1 %vm91_vm10, %v519_v45 }
  0x99   :  { %v74_v56 = vpop.permute.xlu1 %73  ;;  %v50_v57 = vpop.permute.xlu0 %49 }
  0x9a   :  { %vm92_vm12 = vcmp.eq.s32.totalorder %v29_v42, %v74_v56  ;;  %vm84_vm13 = vcmp.eq.s32.totalorder %v29_v42, %v50_v57 }
  0x9b   :  { %424 = vmatprep.mubr.msk.f32.mxu0 %vm84_vm13, %v519_v45  ;;  %436 = vmatprep.mubr.msk.f32.mxu1 %vm92_vm12, %v519_v45 }
  0x9d   :  { %v77_v58 = vpop.permute.xlu1 %76  ;;  %v53_v59 = vpop.permute.xlu0 %52 }
  0x9e   :  { %vm93_vm14 = vcmp.eq.s32.totalorder %v29_v42, %v77_v58  ;;  %vm85_vm15 = vcmp.eq.s32.totalorder %v29_v42, %v53_v59 }
  0x9f   :  { %425 = vmatmul.mubr.msk.f32.gmra.mrb[6].mxu0 %vm85_vm15, %v519_v45  ;;  %437 = vmatmul.mubr.msk.f32.gmra.mrb[6].mxu1 %vm93_vm14, %v519_v45 }
 0x157   :  { %v417_v60 = vpop.f32.mrb[0].mxu0 }
 0x158   :  { %288 = vst [vmem:[#allocation2 + $0x8] sm:$0xff] %v417_v60  ;;  %v208_v61 = vpop.f32.mrb[1].mxu0 }
 0x159   :  { %287 = vst [vmem:[#allocation2] sm:$0xff] %v208_v61 }
 0x15b   :  { %v429_v62 = vpop.f32.mrb[0].mxu1 }
 0x15c   :  { %296 = vst [vmem:[#allocation2 + $0x48] sm:$0xff] %v429_v62  ;;  %v248_v63 = vpop.f32.mrb[1].mxu1 }
 0x15d   :  { %295 = vst [vmem:[#allocation2 + $0x40] sm:$0xff] %v248_v63 }
 0x162   :  { %v420_v0 = vpop.f32.mrb[2].mxu0  ;;  %v432_v1 = vpop.f32.mrb[2].mxu1 }
 0x163   :  { %290 = vst [vmem:[#allocation2 + $0x18] sm:$0xff] %v420_v0  ;;  %298 = vst [vmem:[#allocation2 + $0x58] sm:$0xff] %v432_v1  ;;  %v218_v2 = vpop.f32.mrb[3].mxu0  ;;  %v258_v3 = vpop.f32.mrb[3].mxu1 }
 0x164   :  { %289 = vst [vmem:[#allocation2 + $0x10] sm:$0xff] %v218_v2  ;;  %297 = vst [vmem:[#allocation2 + $0x50] sm:$0xff] %v258_v3 }
 0x16a   :  { %v423_v4 = vpop.f32.mrb[4].mxu0  ;;  %v435_v5 = vpop.f32.mrb[4].mxu1 }
 0x16b   :  { %292 = vst [vmem:[#allocation2 + $0x28] sm:$0xff] %v423_v4  ;;  %300 = vst [vmem:[#allocation2 + $0x68] sm:$0xff] %v435_v5  ;;  %v228_v6 = vpop.f32.mrb[5].mxu0  ;;  %v268_v7 = vpop.f32.mrb[5].mxu1 }
 0x16c   :  { %291 = vst [vmem:[#allocation2 + $0x20] sm:$0xff] %v228_v6  ;;  %299 = vst [vmem:[#allocation2 + $0x60] sm:$0xff] %v268_v7 }
 0x172   :  { %v426_v8 = vpop.f32.mrb[6].mxu0  ;;  %v438_v9 = vpop.f32.mrb[6].mxu1 }
 0x173   :  { %294 = vst [vmem:[#allocation2 + $0x38] sm:$0xff] %v426_v8  ;;  %302 = vst [vmem:[#allocation2 + $0x78] sm:$0xff] %v438_v9  ;;  %v238_v10 = vpop.f32.mrb[7].mxu0  ;;  %v278_v11 = vpop.f32.mrb[7].mxu1 }
 0x174   :  { %293 = vst [vmem:[#allocation2 + $0x30] sm:$0xff] %v238_v10  ;;  %301 = vst [vmem:[#allocation2 + $0x70] sm:$0xff] %v278_v11 }
 0x175   :  { %505 = shalt.err (!%p502_p4)
}
 0x176   :  { %s506_s20 = scalar_lea.hbm %s648_s2, 2048 }
 0x177   :  { %p507_p5 = scmp.ne.s32.totalorder %s648_s2, %s506_s20  ;;  %p510_p6 = scmp.lt.u32.totalorder %s506_s20, %s648_s2 }
 0x179   :  { %p512_p7 = pnand %p510_p6, %p507_p5 }
 0x17b   :  { %515 = shalt.err (!%p512_p7)
}
 0x17c   :  { %s521_s25 = smov 128   ;;  %s522_s26 = smov 8  }
 0x17d   :  { %314 = dma.vmem_to_hbm [thread:$0]  %s309_s1, 2048, %s648_s2, [#allocation3], %s521_s25, %s521_s25, %s522_s26  }
 0x17e   :  { %516 = dma.done.wait [#allocation3], 2048  }
 0x17f   :  { %517 = vsyncadd [#allocation3], 4294965248 }
 0x180   :  { %318 = vsyncpa [#allocation3], 1 }

</bundles_post_ra>
